<compile_context>
chip_gen: v7x
topology: tpu7x:2x2x1
jax: 0.10.0
libtpu: 0.0.40
codegen_flags: <defaults>
</compile_context>

<pallas_src>
import functools
import math

import jax
import jax.numpy as jnp
from jax.experimental import pallas as pl
from jax.experimental.pallas import tpu as pltpu


def make_rotary_omega(dim: int, t_min: float = 1e-5, t_max: float = 4.0) -> jnp.ndarray:
    """Deterministic parameter init identical to the PyTorch __init__."""
    omega = jnp.zeros((dim // 2,), dtype=jnp.float32)
    k = jnp.arange(0, dim // 2, 2, dtype=jnp.float32)              # dim // 4 entries
    freqs = 2.0 * math.pi / (t_min * (t_max / t_min) ** (k / (dim // 2)))
    omega = omega.at[: dim // 4].set(freqs.astype(jnp.float32))
    return omega


def _make_rotary_kernel(k: int, dim: int):
    """Kernel over one (tr, k) timestamp block -> (tr, k*dim) angle block."""

    def kernel(t_ref, w_ref, out_ref):
        # t_ref:  (tr, k)       packed timestamps (k timestamps per output row)
        # w_ref:  (1, k*dim)    interleaved omega tiled k times
        # out_ref:(tr, k*dim)   lane-dense angles
        t = t_ref[...]
        w = w_ref[...]
        tr = t.shape[0]
        if k == 1:
            t_exp = jnp.broadcast_to(t, (tr, dim))
        else:
            # Lane-broadcast each packed column across its dim lanes, then
            # concatenate along lanes (XLU work, separate slot from vst/VPU).
            cols = [jnp.broadcast_to(t[:, j:j + 1], (tr, dim)) for j in range(k)]
            t_exp = jnp.concatenate(cols, axis=-1)                 # (tr, k*dim)
        out_ref[...] = t_exp * w                                   # f32 VPU multiply

    return kernel


@functools.partial(jax.jit, static_argnames=("tile_rows",))
def rotary_embedding_forward(
    timestamps: jnp.ndarray, omega: jnp.ndarray, *, tile_rows: int = 8192
) -> jnp.ndarray:
    """angles = repeat(timestamps[..., None] * omega, '... n -> ... (n r)', r=2)"""
    dim_half = omega.shape[0]
    dim = 2 * dim_half

    lead_shape = timestamps.shape
    n = math.prod(lead_shape) if lead_shape else 1

    # Packing factor: largest k <= 128 // dim that divides n, so no host-side
    # padding and no post-kernel slice copy is ever required.
    k_max = 128 // dim if (dim < 128 and 128 % dim == 0) else 1
    k = 1
    for cand in range(k_max, 0, -1):
        if n % cand == 0:
            k = cand
            break
    lane_w = k * dim
    rows = n // k

    # repeat '... n -> ... (n r)', r=2 applied to omega pre-multiply (same math),
    # then tiled across the k packed timestamps per row.
    omega_rep = jnp.repeat(omega.astype(jnp.float32), 2)           # (dim,)
    w = jnp.tile(omega_rep, k)[None, :]                            # (1, lane_w)

    t_packed = timestamps.reshape(rows, k).astype(jnp.float32)

    # Row tile: large (amortize ~0.35us/step), capped so medium/large inputs
    # produce >= 2-4 grid steps (v7x megacore), never shrinking blocks below
    # ~1 MiB where the split would not pay for itself.
    megacore_cap = max(2048, ((rows // 4) // 8) * 8)
    tr = min(tile_rows, rows, megacore_cap)
    if tr < rows:
        tr = max(8, (tr // 8) * 8)                                 # sublane-aligned

    grid = (pl.cdiv(rows, tr),)

    # Working set: in + out blocks, double-buffered; the (tr, k) input block is
    # lane-padded to 128 lanes in VMEM so it costs the same as the output block.
    vmem_limit = min(4 * tr * 128 * 4 + (4 << 20), 48 << 20)

    out = pl.pallas_call(
        _make_rotary_kernel(k, dim),
        out_shape=jax.ShapeDtypeStruct((rows, lane_w), jnp.float32),
        grid=grid,
        in_specs=[
            pl.BlockSpec((tr, k), lambda i: (i, 0)),
            pl.BlockSpec((1, lane_w), lambda i: (0, 0)),
        ],
        out_specs=pl.BlockSpec((tr, lane_w), lambda i: (i, 0)),
        compiler_params=pltpu.CompilerParams(
            dimension_semantics=("parallel",),
            vmem_limit_bytes=vmem_limit,
        ),
    )(t_packed, w)

    # Packed (rows, k*dim) has the same flat layout as (n, dim): free reshape.
    return out.reshape(*lead_shape, dim)


def rotary_embedding_reference(timestamps: jnp.ndarray, omega: jnp.ndarray) -> jnp.ndarray:
    angles = timestamps[..., None].astype(jnp.float32) * omega.astype(jnp.float32)[None, :]
    return jnp.repeat(angles, 2, axis=-1)


if __name__ == "__main__":
    dim = 32
    batch, seq = 2, 8

    key = jax.random.PRNGKey(0)
    timestamps = jax.random.uniform(key, (batch, seq), dtype=jnp.float32) * 4.0

    omega = make_rotary_omega(dim, t_min=1e-5, t_max=4.0)

    angles = rotary_embedding_forward(timestamps, omega)
    angles = jax.block_until_ready(angles)

    ref = rotary_embedding_reference(timestamps, omega)
    assert angles.shape == (batch, seq, dim), angles.shape
    assert jnp.allclose(angles, ref, atol=1e-5, rtol=1e-5), "mismatch vs reference"

    print("KERNEL_OK")
</pallas_src>

<mosaic_0001>
module attributes {stable_mosaic.version = 11 : i64} {
  func.func @kernel(%arg0: i32, %arg1: memref<4x4xf32, #tpu.memory_space<vmem>>, %arg2: memref<1x128xf32, #tpu.memory_space<vmem>>, %arg3: memref<4x128xf32, #tpu.memory_space<vmem>>) attributes {dimension_semantics = [#tpu.dimension_semantics<parallel>], iteration_bounds = array<i64: 1>, scalar_prefetch = 0 : i64, scratch_operands = 0 : i64, tpu.core_type = #tpu.core_type<tc>, window_params = [{transform_indices = @transform_0, window_bounds = array<i64: 4, 4>}, {pipeline_mode = #tpu.pipeline_mode<synchronous>, transform_indices = @transform_1, window_bounds = array<i64: 1, 128>}, {transform_indices = @transform_2, window_bounds = array<i64: 4, 128>}]} {
    %c0 = arith.constant 0 : index
    %c0_0 = arith.constant 0 : index
    %0 = vector.load %arg1[%c0, %c0_0] : memref<4x4xf32, #tpu.memory_space<vmem>>, vector<4x4xf32>
    %c0_1 = arith.constant 0 : index
    %c0_2 = arith.constant 0 : index
    %1 = vector.load %arg2[%c0_1, %c0_2] : memref<1x128xf32, #tpu.memory_space<vmem>>, vector<1x128xf32>
    %2 = vector.extract_strided_slice %0 {offsets = [0, 0], sizes = [4, 1], strides = [1, 1]} : vector<4x4xf32> to vector<4x1xf32>
    %3 = vector.shape_cast %2 : vector<4x1xf32> to vector<4x1xf32>
    %4 = vector.broadcast %3 : vector<4x1xf32> to vector<4x32xf32>
    %5 = vector.extract_strided_slice %0 {offsets = [0, 1], sizes = [4, 1], strides = [1, 1]} : vector<4x4xf32> to vector<4x1xf32>
    %6 = vector.shape_cast %5 : vector<4x1xf32> to vector<4x1xf32>
    %7 = vector.broadcast %6 : vector<4x1xf32> to vector<4x32xf32>
    %8 = vector.extract_strided_slice %0 {offsets = [0, 2], sizes = [4, 1], strides = [1, 1]} : vector<4x4xf32> to vector<4x1xf32>
    %9 = vector.shape_cast %8 : vector<4x1xf32> to vector<4x1xf32>
    %10 = vector.broadcast %9 : vector<4x1xf32> to vector<4x32xf32>
    %11 = vector.extract_strided_slice %0 {offsets = [0, 3], sizes = [4, 1], strides = [1, 1]} : vector<4x4xf32> to vector<4x1xf32>
    %12 = vector.shape_cast %11 : vector<4x1xf32> to vector<4x1xf32>
    %13 = vector.broadcast %12 : vector<4x1xf32> to vector<4x32xf32>
    %14 = tpu.concatenate %4, %7, %10, %13 in 1 : vector<4x32xf32>, vector<4x32xf32>, vector<4x32xf32>, vector<4x32xf32> -> vector<4x128xf32>
    %15 = vector.broadcast %1 : vector<1x128xf32> to vector<4x128xf32>
    %16 = arith.mulf %14, %15 : vector<4x128xf32>
    %c0_3 = arith.constant 0 : index
    %c0_4 = arith.constant 0 : index
    %17 = vector.load %arg3[%c0_3, %c0_4] : memref<4x128xf32, #tpu.memory_space<vmem>>, vector<4x128xf32>
    tpu.vector_store %arg3[%c0_3, %c0_4], %16 {strides = array<i32>} : memref<4x128xf32, #tpu.memory_space<vmem>>, vector<4x128xf32>,
    return
  }
  func.func @transform_0(%arg0: i32) -> (i32, i32) {
    %c0_i32 = arith.constant 0 : i32
    %c0_i32_0 = arith.constant 0 : i32
    return %arg0, %c0_i32 : i32, i32
  }
  func.func @transform_1(%arg0: i32) -> (i32, i32) {
    %c0_i32 = arith.constant 0 : i32
    %c0_i32_0 = arith.constant 0 : i32
    %c0_i32_1 = arith.constant 0 : i32
    return %c0_i32, %c0_i32_0 : i32, i32
  }
  func.func @transform_2(%arg0: i32) -> (i32, i32) {
    %c0_i32 = arith.constant 0 : i32
    %c0_i32_0 = arith.constant 0 : i32
    return %arg0, %c0_i32 : i32, i32
  }
}

</mosaic_0001>

<bundles_post_ra>
// kernel: tile.6
= control target key start
LH: loop header
LB: loop body
LE: loop exit
PB: predicated region body
PF: predicated region fallthrough
CT: control target
= control target key end

     0   :  { %s22_s0 = inlined_call_operand.vmem [shape: f32[32], index: 0, kind: input, shape index: {}]   ;;  %s23_s1 = inlined_call_operand.vmem [shape: f32[4,32], index: 1, kind: output, shape index: {}]  }
   0x1   :  { %v4_v0 = vld [vmem:[%s22_s0] ss:$0 sm:$0xff] }
   0x2   :  { %5 = vst [vmem:[%s23_s1] sm:$0xf] %v4_v0 }

// kernel: tile.7
= control target key start
LH: loop header
LB: loop body
LE: loop exit
PB: predicated region body
PF: predicated region fallthrough
CT: control target
= control target key end

     0   :  { %vm7_vm0 = vcmask 261120   ;;  %s37_s8 = smov 32   ;;  %s38_s9 = smov 64   ;;  %vm13_vm1 = vcmask 1048320   ;;  %vm19_vm2 = vcmask 785920   ;;  %vm25_vm3 = vcmask 523520   ;;  %s55_s0 = inlined_call_operand.vmem [shape: f32[4,32], index: 0, kind: input, shape index: {}]   ;;  %s56_s1 = inlined_call_operand.vmem [shape: f32[1,128], index: 1, kind: output, shape index: {}]  }
   0x1   :  { %v4_v0 = vld [vmem:[%s55_s0] sm:$0xf]  ;;  %s36_s0 = smov 96  }
   0x2   :  { %5 = vst [vmem:[#allocation1] sm:$0xf] %v4_v0 }
   0x9   :  { %v10_v1 = vld [vmem:[#allocation1 + $0x3] sm:$0x1]   ;;  %v22_v2 = vld [vmem:[#allocation1 + $0x1] sm:$0x1]   ;;  %v6_v3 = vld [vmem:[#allocation1] sm:$0x1]  }
   0xa   :  { %11 = vrot.lane.b32.xlu0 %v10_v1, %s36_s0  ;;  %23 = vrot.lane.b32.xlu1 %v22_v2, %s37_s8  ;;  %v16_v4 = vld [vmem:[#allocation1 + $0x2] sm:$0x1]   ;;  %8 = vst.msk [vmem:[#allocation0] sm:$0x1] %vm7_vm0, %v6_v3  }
   0xe   :  { %17 = vrot.lane.b32.xlu0 %v16_v4, %s38_s9 }
  0x7c   :  { %v12_v5 = vpop.permute.xlu0 %11   ;;  %v24_v6 = vpop.permute.xlu1 %23  }
  0x7d   :  { %14 = vst.msk [vmem:[#allocation0] sm:$0x1] %vm13_vm1, %v12_v5  }
  0x80   :  { %v18_v7 = vpop.permute.xlu0 %17  }
  0x81   :  { %20 = vst.msk [vmem:[#allocation0] sm:$0x1] %vm19_vm2, %v18_v7  }
  0x82   :  { %26 = vst.msk [vmem:[#allocation0] sm:$0x1] %vm25_vm3, %v24_v6  }
  0x89   :  { %v30_v8 = vld [vmem:[#allocation0] sm:$0x1] }
  0x8a   :  { %32 = vst [vmem:[%s56_s1] sm:$0x1] %v30_v8 }

// kernel: tile.5
= control target key start
LH: loop header
LB: loop body
LE: loop exit
PB: predicated region body
PF: predicated region fallthrough
CT: control target
= control target key end

     0   :  { %s131_s10 = smov 30   ;;  %s132_s11 = smov 26   ;;  %vm3_vm0 = vcmask 15360   ;;  %vm9_vm1 = vcmask 261360   ;;  %vm15_vm2 = vcmask 244960   ;;  %vm21_vm3 = vcmask 228560   ;;  %s207_s0 = inlined_call_operand.vmem [shape: f32[16,2], index: 0, kind: input, shape index: {}]   ;;  %s208_s1 = inlined_call_operand.vmem [shape: f32[32], index: 1, kind: output, shape index: {}]  }
   0x1   :  { %v101_v0 = vld [vmem:[%s207_s0 + $0xf] sm:$0x1]   ;;  %v103_v1 = vld [vmem:[%s207_s0 + $0xd] sm:$0x1]   ;;  %v102_v2 = vld [vmem:[%s207_s0 + $0xe] sm:$0x1]  }
   0x2   :  { %7 = vrot.lane.b32.xlu0 %v101_v0, %s131_s10  ;;  %19 = vrot.lane.b32.xlu1 %v103_v1, %s132_s11  ;;  %v104_v3 = vld [vmem:[%s207_s0 + $0xc] sm:$0x1]   ;;  %s133_s16 = smov 28   ;;  %s134_s17 = smov 24   ;;  %v105_v4 = vld [vmem:[%s207_s0 + $0xb] sm:$0x1]  }
   0x3   :  { %v106_v5 = vld [vmem:[%s207_s0 + $0xa] sm:$0x1]   ;;  %v2_v6 = vld [vmem:[%s207_s0] sm:$0x1]   ;;  %s135_s24 = smov 22   ;;  %s136_s25 = smov 20  }
   0x4   :  { %4 = vst.msk [vmem:[#allocation0] sm:$0x1] %vm3_vm0, %v2_v6   ;;  %v107_v7 = vld [vmem:[%s207_s0 + $0x9] sm:$0x1]   ;;  %v108_v8 = vld [vmem:[%s207_s0 + $0x8] sm:$0x1]  }
   0x5   :  { %s137_s30 = smov 18   ;;  %s138_s2 = smov 16   ;;  %v109_v9 = vld [vmem:[%s207_s0 + $0x7] sm:$0x1]   ;;  %v110_v10 = vld [vmem:[%s207_s0 + $0x6] sm:$0x1]  }
   0x6   :  { %13 = vrot.lane.b32.xlu0 %v102_v2, %s133_s16  ;;  %25 = vrot.lane.b32.xlu1 %v104_v3, %s134_s17  ;;  %s139_s7 = smov 14   ;;  %s140_s8 = smov 12   ;;  %v111_v11 = vld [vmem:[%s207_s0 + $0x5] sm:$0x1]   ;;  %v112_v12 = vld [vmem:[%s207_s0 + $0x4] sm:$0x1]  }
   0x7   :  { %s141_s13 = smov 10   ;;  %s142_s14 = smov 8   ;;  %v113_v13 = vld [vmem:[%s207_s0 + $0x3] sm:$0x1]   ;;  %v114_v14 = vld [vmem:[%s207_s0 + $0x2] sm:$0x1]  }
   0x8   :  { %s143_s19 = smov 6   ;;  %s144_s20 = smov 4   ;;  %v115_v15 = vld [vmem:[%s207_s0 + $0x1] sm:$0x1]   ;;  %vm27_vm4 = vcmask 212160   ;;  %vm33_vm5 = vcmask 195760  }
   0x9   :  { %s145_s0 = smov 2   ;;  %vm39_vm6 = vcmask 179360   ;;  %vm45_vm7 = vcmask 162960   ;;  %vm51_vm8 = vcmask 146560   ;;  %vm57_vm9 = vcmask 130160  }
   0xa   :  { %31 = vrot.lane.b32.xlu0 %v105_v4, %s135_s24  ;;  %37 = vrot.lane.b32.xlu1 %v106_v5, %s136_s25  ;;  %vm63_vm10 = vcmask 113760   ;;  %vm69_vm11 = vcmask 97360   ;;  %vm75_vm12 = vcmask 80960   ;;  %vm81_vm13 = vcmask 64560  }
   0xb   :  { %vm87_vm14 = vcmask 48160   ;;  %vm93_vm15 = vcmask 31760  }
   0xe   :  { %43 = vrot.lane.b32.xlu0 %v107_v7, %s137_s30  ;;  %49 = vrot.lane.b32.xlu1 %v108_v8, %s138_s2 }
  0x12   :  { %55 = vrot.lane.b32.xlu0 %v109_v9, %s139_s7  ;;  %61 = vrot.lane.b32.xlu1 %v110_v10, %s140_s8 }
  0x16   :  { %67 = vrot.lane.b32.xlu0 %v111_v11, %s141_s13  ;;  %73 = vrot.lane.b32.xlu1 %v112_v12, %s142_s14 }
  0x1a   :  { %79 = vrot.lane.b32.xlu0 %v113_v13, %s143_s19  ;;  %85 = vrot.lane.b32.xlu1 %v114_v14, %s144_s20 }
  0x1e   :  { %91 = vrot.lane.b32.xlu0 %v115_v15, %s145_s0 }
  0x74   :  { %v8_v16 = vpop.permute.xlu0 %7   ;;  %v20_v17 = vpop.permute.xlu1 %19  }
  0x75   :  { %10 = vst.msk [vmem:[#allocation0] sm:$0x1] %vm9_vm1, %v8_v16  }
  0x78   :  { %v14_v18 = vpop.permute.xlu0 %13   ;;  %v26_v19 = vpop.permute.xlu1 %25  }
  0x79   :  { %16 = vst.msk [vmem:[#allocation0] sm:$0x1] %vm15_vm2, %v14_v18  }
  0x7a   :  { %22 = vst.msk [vmem:[#allocation0] sm:$0x1] %vm21_vm3, %v20_v17  }
  0x7b   :  { %28 = vst.msk [vmem:[#allocation0] sm:$0x1] %vm27_vm4, %v26_v19  }
  0x7c   :  { %v32_v20 = vpop.permute.xlu0 %31   ;;  %v38_v21 = vpop.permute.xlu1 %37  }
  0x7d   :  { %34 = vst.msk [vmem:[#allocation0] sm:$0x1] %vm33_vm5, %v32_v20  }
  0x7e   :  { %40 = vst.msk [vmem:[#allocation0] sm:$0x1] %vm39_vm6, %v38_v21  }
  0x80   :  { %v44_v22 = vpop.permute.xlu0 %43   ;;  %v50_v23 = vpop.permute.xlu1 %49  }
  0x81   :  { %46 = vst.msk [vmem:[#allocation0] sm:$0x1] %vm45_vm7, %v44_v22  }
  0x82   :  { %52 = vst.msk [vmem:[#allocation0] sm:$0x1] %vm51_vm8, %v50_v23  }
  0x84   :  { %v56_v24 = vpop.permute.xlu0 %55   ;;  %v62_v25 = vpop.permute.xlu1 %61  }
  0x85   :  { %58 = vst.msk [vmem:[#allocation0] sm:$0x1] %vm57_vm9, %v56_v24  }
  0x86   :  { %64 = vst.msk [vmem:[#allocation0] sm:$0x1] %vm63_vm10, %v62_v25  }
  0x88   :  { %v68_v26 = vpop.permute.xlu0 %67   ;;  %v74_v27 = vpop.permute.xlu1 %73  }
  0x89   :  { %70 = vst.msk [vmem:[#allocation0] sm:$0x1] %vm69_vm11, %v68_v26  }
  0x8a   :  { %76 = vst.msk [vmem:[#allocation0] sm:$0x1] %vm75_vm12, %v74_v27  }
  0x8c   :  { %v80_v28 = vpop.permute.xlu0 %79   ;;  %v86_v29 = vpop.permute.xlu1 %85  }
  0x8d   :  { %82 = vst.msk [vmem:[#allocation0] sm:$0x1] %vm81_vm13, %v80_v28  }
  0x8e   :  { %88 = vst.msk [vmem:[#allocation0] sm:$0x1] %vm87_vm14, %v86_v29  }
  0x90   :  { %v92_v30 = vpop.permute.xlu0 %91  }
  0x91   :  { %94 = vst.msk [vmem:[#allocation0] sm:$0x1] %vm93_vm15, %v92_v30  }
  0x98   :  { %v98_v31 = vld [vmem:[#allocation0] sm:$0x1] }
  0x99   :  { %100 = vst [vmem:[%s208_s1] sm:$0x1] %v98_v31 }

// kernel: rotary_embedding_forward.1
= control target key start
LH: loop header
LB: loop body
LE: loop exit
PB: predicated region body
PF: predicated region fallthrough
CT: control target
= control target key end

     0   :  { %v58_v0 = vmov 0   ;;  %v59_v2 = vmov 2   ;;  %v60_v3 = vmov 1   ;;  %v61_v4 = vmov 3   ;;  %s86_s0 = inlined_call_operand.vmem [shape: f32[4,4], index: 0, kind: input, shape index: {}]   ;;  %s87_s1 = inlined_call_operand.vmem [shape: f32[1,128], index: 1, kind: input, shape index: {}]   ;;  %s88_s2 = inlined_call_operand.vmem [shape: f32[4,128], index: 2, kind: output, shape index: {}]  }
   0x1   :  { %53 = vset.pattern.permute.xlu0 %v58_v0  ;;  %v11_v1 = vld [vmem:[%s86_s0] sm:$0xf]  ;;  %55 = vset.pattern.permute.xlu1 %v59_v2  ;;  %vm30_vm0 = vcmask 261120   ;;  %vm32_vm1 = vcmask 523264   ;;  %vm34_vm2 = vcmask 785408  }
   0x2   :  { %15 = vperm.xlu0 %53, %v11_v1   ;;  %23 = vperm.xlu1 %55, %v11_v1   ;;  %v48_v10 = vld [vmem:[%s87_s1] ss:$0 sm:$0xff] }
   0x6   :  { %54 = vset.pattern.permute.xlu0 %v60_v3  ;;  %56 = vset.pattern.permute.xlu1 %v61_v4 }
   0x7   :  { %19 = vperm.xlu0 %54, %v11_v1   ;;  %27 = vperm.xlu1 %56, %v11_v1  }
   0xb   :  { %57 = vset.pattern.permute.xlu0 %v61_v4 }
  0x81   :  { %v16_v5 = vpop.permute.xlu0 %15  ;;  %v24_v6 = vpop.permute.xlu1 %23 }
  0x86   :  { %v20_v7 = vpop.permute.xlu0 %19  ;;  %v28_v8 = vpop.permute.xlu1 %27 }
  0x87   :  { %v31_v9 = vsel %vm30_vm0, %v16_v5, %v20_v7 }
  0x88   :  { %v33_v11 = vsel %vm32_vm1, %v31_v9, %v24_v6 }
  0x89   :  { %v35_v12 = vsel %vm34_vm2, %v33_v11, %v28_v8 }
  0x8a   :  { %v42_v13 = vmul.f32 %v48_v10, %v35_v12 }
  0x8c   :  { %43 = vst [vmem:[%s88_s2] sm:$0xf] %v42_v13 }

</bundles_post_ra>
